<compile_context>
chip_gen: v7x
topology: tpu7x:2x2x1
jax: 0.10.0
libtpu: 0.0.40
codegen_flags: <defaults>
</compile_context>

<pallas_src>
import functools

import jax
import jax.numpy as jnp
from jax import lax
from jax.experimental import pallas as pl
from jax.experimental.pallas import tpu as pltpu

_BIG = 1e30  # stand-in for +inf when masking invalid centroid rows


def _kmeans_kernel(xaug_ref, out_ref, shift_sc, added_sc, *, n_clusters,
                   max_iter, tol):
    f32 = jnp.float32
    K = n_clusters
    Dp1, N = xaug_ref.shape          # (D+1, N): lane-dense points + ones row
    D = Dp1 - 1

    def read_xt():
        # Re-read X at each use (vld slots are idle); do NOT keep it live in
        # vregs across the Lloyd loop.
        return xaug_ref[0:D, :].astype(f32)                          # (D, N)

    # ---- hoisted loop invariants (a few vregs only) --------------------------
    xt_once = read_xt()
    xsq_row = lax.dot_general(jnp.ones((1, D), f32), xt_once * xt_once,
                              (((1,), (0,)), ((), ())),
                              preferred_element_type=f32)            # (1, N)
    rows_kn = lax.broadcasted_iota(jnp.int32, (K, N), 0)             # (K, N)
    cols_1n = lax.broadcasted_iota(jnp.int32, (1, N), 1)             # (1, N)
    rows_k1 = lax.broadcasted_iota(jnp.int32, (K, 1), 0)             # (K, 1)

    def sq_dists(cent):
        """Squared Euclidean distances (K, N) -- NN matmul with N on lanes."""
        c_sq = jnp.sum(cent * cent, axis=1, keepdims=True)           # (K, 1)
        cross = lax.dot_general(cent, read_xt(), (((1,), (0,)), ((), ())),
                                preferred_element_type=f32)          # (K, N)
        return jnp.maximum(c_sq + xsq_row - 2.0 * cross, 0.0)

    def row_sq_dist(c_row):
        """Squared distances of all points to a single (1, D) centroid."""
        c_sq = jnp.sum(c_row * c_row, axis=1, keepdims=True)         # (1, 1)
        cross = lax.dot_general(c_row, read_xt(), (((1,), (0,)), ((), ())),
                                preferred_element_type=f32)          # (1, N)
        return jnp.maximum(c_sq + xsq_row - 2.0 * cross, 0.0)

    def gather_point(onehot_1n):
        """(1, N) one-hot -> that point as a (1, D) row."""
        # TODO(synk): on v5e, extracting the index to a scalar and doing a
        # dynamic-slice load would drop one dependent MXU round trip per
        # seeded centroid (rare path; kept as a matmul gather here).
        return lax.dot_general(onehot_1n, read_xt(), (((1,), (1,)), ((), ())),
                               preferred_element_type=f32)           # (1, D)

    def outlier_row(min_sq):
        """Farthest point (first argmax of per-point min sq-distance)."""
        max_v = jnp.max(min_sq, axis=1, keepdims=True)               # (1, 1)
        idx = jnp.min(jnp.where(min_sq >= max_v, cols_1n, N),
                      axis=1, keepdims=True)                         # (1, 1)
        return gather_point((cols_1n == idx).astype(f32))            # (1, D)

    def fill_missing(cent, valid_f, min_sq):
        """Farthest-point seeding of invalid slots; min_sq kept incrementally."""
        def fill_body(k, carry):
            cent, valid_f, min_sq = carry
            orow = outlier_row(min_sq)                               # (1, D)
            fill = jnp.logical_and(rows_k1 == k, valid_f < 0.5)      # (K, 1)
            cent = jnp.where(fill, orow, cent)
            did = jnp.max(fill.astype(f32), axis=0, keepdims=True)   # (1, 1)
            d_new = row_sq_dist(orow)                                # (1, N)
            min_sq = jnp.where(did > 0.5, jnp.minimum(min_sq, d_new), min_sq)
            valid_f = jnp.maximum(valid_f, fill.astype(f32))
            return cent, valid_f, min_sq

        cent, _, _ = lax.fori_loop(0, K, fill_body, (cent, valid_f, min_sq))
        return cent

    # ---- centroids_init(X, None): slot 0 = X[0]; rest via farthest point ----
    x0 = gather_point((cols_1n == 0).astype(f32))                    # (1, D)
    cent0 = jnp.where(rows_k1 == 0, x0, jnp.zeros((K, D), f32))
    cent0 = fill_missing(cent0, (rows_k1 == 0).astype(f32), row_sq_dist(x0))

    # ---- Lloyd iterations: while_loop carrying (iter, done, centroids) ------
    def cond_fn(carry):
        i, done, _ = carry
        return jnp.logical_and(i < max_iter, done == 0)

    def body_fn(carry):
        i, _, cent = carry

        d2 = sq_dists(cent)                                          # (K, N)
        min_d2 = jnp.min(d2, axis=0, keepdims=True)                  # (1, N)
        lbl = jnp.min(jnp.where(d2 <= min_d2, rows_kn, K),
                      axis=0, keepdims=True)                         # first argmin
        mask = (rows_kn == lbl).astype(f32)                          # (K, N)

        # Fused [sums | counts] = mask @ [X ; 1]^T  (one matmul, no separate
        # count reduction).
        sums_aug = lax.dot_general(mask, xaug_ref[...].astype(f32),
                                   (((1,), (1,)), ((), ())),
                                   preferred_element_type=f32)       # (K, D+1)
        sums = sums_aug[:, 0:D]                                      # (K, D)
        counts = sums_aug[:, D:D + 1]                                # (K, 1)
        empty = counts < 0.5                                         # (K, 1)
        mean = sums * pl.reciprocal(jnp.maximum(counts, 1.0), approx=True)

        sq_shift = jnp.where(empty, 0.0, (mean - cent) ** 2)         # (K, D)
        shift = jnp.sum(jnp.sum(sq_shift, axis=1, keepdims=True),
                        axis=0, keepdims=True)                       # (1, 1)
        added = jnp.max(empty.astype(f32), axis=0, keepdims=True)    # (1, 1)
        cent_new = jnp.where(empty, cent, mean)      # keep old in empty slots

        # (1,1) vector -> scalar via a VMEM scratch round trip (SMEM cannot be
        # stored to from a vector value).  Written + read once per iteration;
        # no state is carried across iterations through refs.
        shift_sc[...] = shift
        added_sc[...] = added
        shift_s = shift_sc[0, 0]
        added_s = added_sc[0, 0]

        # Rare path: a cluster went empty -> farthest-point re-seed it.
        def _reseed(c):
            d2v = jnp.where(empty, _BIG, sq_dists(c))                # (K, N)
            min_sq = jnp.min(d2v, axis=0, keepdims=True)             # (1, N)
            valid_f = jnp.where(empty, 0.0, 1.0)                     # (K, 1)
            return fill_missing(c, valid_f, min_sq)

        cent_out = lax.cond(added_s > 0.5, _reseed, lambda c: c, cent_new)
        done = jnp.logical_and(shift_s <= tol,
                               added_s < 0.5).astype(jnp.int32)
        return i + 1, done, cent_out

    _, _, cent_final = lax.while_loop(cond_fn, body_fn,
                                      (jnp.int32(0), jnp.int32(0), cent0))
    out_ref[...] = cent_final.astype(out_ref.dtype)


def kmeans_pp(x, n_clusters, max_iter=100, tol=1e-4):
    n, d = x.shape
    # Lane-dense layout: points on lanes (last axis), features on sublanes,
    # plus a fused row of ones so [sums | counts] come from a single matmul.
    x_aug = jnp.concatenate(
        [x.astype(jnp.float32).T, jnp.ones((1, n), jnp.float32)], axis=0)

    kernel = functools.partial(_kmeans_kernel, n_clusters=n_clusters,
                               max_iter=max_iter, tol=tol)

    # VMEM budget derived from the actual footprint (plus generous headroom),
    # capped well below v7x's 64 MiB per-TensorCore VMEM.
    footprint = int(x_aug.size) * 4 + n_clusters * d * 4
    vmem_limit = min(max(8 * footprint, 16 * 1024 * 1024), 32 * 1024 * 1024)

    return pl.pallas_call(
        kernel,
        out_shape=jax.ShapeDtypeStruct((n_clusters, d), jnp.float32),
        # No grid: the whole (D+1, N) slab sits in VMEM, single-buffered.
        in_specs=[pl.BlockSpec(memory_space=pltpu.MemorySpace.VMEM)],
        out_specs=pl.BlockSpec(memory_space=pltpu.MemorySpace.VMEM),
        scratch_shapes=[pltpu.VMEM((1, 1), jnp.float32),   # shift -> scalar
                        pltpu.VMEM((1, 1), jnp.float32)],  # added -> scalar
        compiler_params=pltpu.CompilerParams(vmem_limit_bytes=vmem_limit),
    )(x_aug)


if __name__ == "__main__":
    key = jax.random.PRNGKey(0)
    k1, k2 = jax.random.split(key)
    N, D, K = 128, 32, 8

    # Synthetic, well-separated clustered data (deterministic).
    centers = jax.random.normal(k1, (K, D), dtype=jnp.float32) * 5.0
    assign = jnp.arange(N) % K
    x = centers[assign] + 0.1 * jax.random.normal(k2, (N, D), dtype=jnp.float32)

    cents = kmeans_pp(x, n_clusters=K, max_iter=100, tol=1e-4)
    cents = jax.block_until_ready(cents)

    assert cents.shape == (K, D)
    assert bool(jnp.all(jnp.isfinite(cents)))
    print("KERNEL_OK")
</pallas_src>

<mosaic_0001>
module attributes {stable_mosaic.version = 11 : i64} {
  func.func @_kmeans_kernel(%arg0: memref<33x128xf32, #tpu.memory_space<vmem>>, %arg1: memref<8x32xf32, #tpu.memory_space<vmem>>, %arg2: memref<1x1xf32, #tpu.memory_space<vmem>>, %arg3: memref<1x1xf32, #tpu.memory_space<vmem>>) attributes {dimension_semantics = [], scalar_prefetch = 0 : i64, scratch_operands = 2 : i64, tpu.core_type = #tpu.core_type<tc>} {
    %c0 = arith.constant 0 : index
    %c0_0 = arith.constant 0 : index
    %0 = vector.load %arg0[%c0, %c0_0] : memref<33x128xf32, #tpu.memory_space<vmem>>, vector<32x128xf32>
    %cst = arith.constant 1.000000e+00 : f32
    %1 = vector.broadcast %cst : f32 to vector<1x32xf32>
    %2 = arith.mulf %0, %0 : vector<32x128xf32>
    %cst_1 = arith.constant dense<0.000000e+00> : vector<1x128xf32>
    %3 = tpu.matmul %1, %2, %cst_1 {dimension_numbers = #tpu.dot_dimension_numbers<[1], [0], [0], [1], [0, 0, 1, 1], [], []>} : vector<1x32xf32>, vector<32x128xf32>, vector<1x128xf32> -> vector<1x128xf32>
    %4 = tpu.iota {dimensions = array<i32: 0>} : vector<8x128xi32>
    %5 = tpu.iota {dimensions = array<i32: 1>} : vector<1x128xi32>
    %6 = tpu.iota {dimensions = array<i32: 0>} : vector<8x1xi32>
    %c0_i32 = arith.constant 0 : i32
    %7 = vector.broadcast %c0_i32 : i32 to vector<1x128xi32>
    %8 = arith.cmpi eq, %5, %7 : vector<1x128xi32>
    %9 = arith.extui %8 : vector<1x128xi1> to vector<1x128xi32>
    %10 = arith.sitofp %9 : vector<1x128xi32> to vector<1x128xf32>
    %c0_2 = arith.constant 0 : index
    %c0_3 = arith.constant 0 : index
    %11 = vector.load %arg0[%c0_2, %c0_3] : memref<33x128xf32, #tpu.memory_space<vmem>>, vector<32x128xf32>
    %cst_4 = arith.constant dense<0.000000e+00> : vector<1x32xf32>
    %12 = tpu.matmul %10, %11, %cst_4 {dimension_numbers = #tpu.dot_dimension_numbers<[1], [1], [0], [0], [0, 0, 1, 0], [], []>} : vector<1x128xf32>, vector<32x128xf32>, vector<1x32xf32> -> vector<1x32xf32>
    %c0_i32_5 = arith.constant 0 : i32
    %13 = vector.broadcast %c0_i32_5 : i32 to vector<8x1xi32>
    %14 = arith.cmpi eq, %6, %13 : vector<8x1xi32>
    %cst_6 = arith.constant 0.000000e+00 : f32
    %15 = vector.broadcast %cst_6 : f32 to vector<8x32xf32>
    %16 = vector.shape_cast %14 : vector<8x1xi1> to vector<8x1xi1>
    %17 = vector.broadcast %16 : vector<8x1xi1> to vector<8x32xi1>
    %18 = vector.shape_cast %12 : vector<1x32xf32> to vector<1x32xf32>
    %19 = vector.broadcast %18 : vector<1x32xf32> to vector<8x32xf32>
    %20 = arith.select %17, %19, %15 : vector<8x32xi1>, vector<8x32xf32>
    %c0_i32_7 = arith.constant 0 : i32
    %21 = vector.broadcast %c0_i32_7 : i32 to vector<8x1xi32>
    %22 = arith.cmpi eq, %6, %21 : vector<8x1xi32>
    %23 = arith.extui %22 : vector<8x1xi1> to vector<8x1xi32>
    %24 = arith.sitofp %23 : vector<8x1xi32> to vector<8x1xf32>
    %25 = arith.mulf %12, %12 : vector<1x32xf32>
    %cst_8 = arith.constant dense<0.000000e+00> : vector<1xf32>
    %26 = vector.multi_reduction <add>, %25, %cst_8 [1] : vector<1x32xf32> to vector<1xf32>
    %27 = vector.shape_cast %26 : vector<1xf32> to vector<1x1xf32>
    %c0_9 = arith.constant 0 : index
    %c0_10 = arith.constant 0 : index
    %28 = vector.load %arg0[%c0_9, %c0_10] : memref<33x128xf32, #tpu.memory_space<vmem>>, vector<32x128xf32>
    %cst_11 = arith.constant dense<0.000000e+00> : vector<1x128xf32>
    %29 = tpu.matmul %12, %28, %cst_11 {dimension_numbers = #tpu.dot_dimension_numbers<[1], [0], [0], [1], [0, 0, 1, 1], [], []>} : vector<1x32xf32>, vector<32x128xf32>, vector<1x128xf32> -> vector<1x128xf32>
    %30 = vector.broadcast %27 : vector<1x1xf32> to vector<1x128xf32>
    %31 = arith.addf %30, %3 : vector<1x128xf32>
    %cst_12 = arith.constant 2.000000e+00 : f32
    %32 = vector.broadcast %cst_12 : f32 to vector<1x128xf32>
    %33 = arith.mulf %32, %29 : vector<1x128xf32>
    %34 = arith.subf %31, %33 : vector<1x128xf32>
    %cst_13 = arith.constant 0.000000e+00 : f32
    %35 = vector.broadcast %cst_13 : f32 to vector<1x128xf32>
    %36 = arith.maximumf %34, %35 : vector<1x128xf32>
    %c0_i32_14 = arith.constant 0 : i32
    %c8_i32 = arith.constant 8 : i32
    %37 = arith.addi %c0_i32_14, %c8_i32 : i32
    %c1_i32 = arith.constant 1 : i32
    %38:3 = scf.for %arg4 = %c0_i32_14 to %37 step %c1_i32 iter_args(%arg5 = %20, %arg6 = %24, %arg7 = %36) -> (vector<8x32xf32>, vector<8x1xf32>, vector<1x128xf32>)  : i32 {
      %cst_20 = arith.constant dense<0xFF800000> : vector<1xf32>
      %41 = vector.multi_reduction <maximumf>, %arg7, %cst_20 [1] : vector<1x128xf32> to vector<1xf32>
      %42 = vector.shape_cast %41 : vector<1xf32> to vector<1x1xf32>
      %43 = vector.broadcast %42 : vector<1x1xf32> to vector<1x128xf32>
      %44 = arith.cmpf oge, %arg7, %43 : vector<1x128xf32>
      %c128_i32 = arith.constant 128 : i32
      %45 = vector.broadcast %c128_i32 : i32 to vector<1x128xi32>
      %46 = arith.select %44, %5, %45 : vector<1x128xi1>, vector<1x128xi32>
      %cst_21 = arith.constant dense<2147483647> : vector<1xi32>
      %47 = vector.multi_reduction <minsi>, %46, %cst_21 [1] : vector<1x128xi32> to vector<1xi32>
      %48 = vector.shape_cast %47 : vector<1xi32> to vector<1x1xi32>
      %49 = vector.broadcast %48 : vector<1x1xi32> to vector<1x128xi32>
      %50 = arith.cmpi eq, %5, %49 : vector<1x128xi32>
      %51 = arith.extui %50 : vector<1x128xi1> to vector<1x128xi32>
      %52 = arith.sitofp %51 : vector<1x128xi32> to vector<1x128xf32>
      %c0_22 = arith.constant 0 : index
      %c0_23 = arith.constant 0 : index
      %53 = vector.load %arg0[%c0_22, %c0_23] : memref<33x128xf32, #tpu.memory_space<vmem>>, vector<32x128xf32>
      %cst_24 = arith.constant dense<0.000000e+00> : vector<1x32xf32>
      %54 = tpu.matmul %52, %53, %cst_24 {dimension_numbers = #tpu.dot_dimension_numbers<[1], [1], [0], [0], [0, 0, 1, 0], [], []>} : vector<1x128xf32>, vector<32x128xf32>, vector<1x32xf32> -> vector<1x32xf32>
      %55 = vector.broadcast %arg4 : i32 to vector<8x1xi32>
      %56 = arith.cmpi eq, %6, %55 : vector<8x1xi32>
      %cst_25 = arith.constant 5.000000e-01 : f32
      %57 = vector.broadcast %cst_25 : f32 to vector<8x1xf32>
      %58 = arith.cmpf olt, %arg6, %57 : vector<8x1xf32>
      %59 = arith.andi %56, %58 : vector<8x1xi1>
      %60 = vector.shape_cast %59 : vector<8x1xi1> to vector<8x1xi1>
      %61 = vector.broadcast %60 : vector<8x1xi1> to vector<8x32xi1>
      %62 = vector.shape_cast %54 : vector<1x32xf32> to vector<1x32xf32>
      %63 = vector.broadcast %62 : vector<1x32xf32> to vector<8x32xf32>
      %64 = arith.select %61, %63, %arg5 : vector<8x32xi1>, vector<8x32xf32>
      %65 = arith.extui %59 : vector<8x1xi1> to vector<8x1xi32>
      %66 = arith.sitofp %65 : vector<8x1xi32> to vector<8x1xf32>
      %cst_26 = arith.constant dense<0xFF800000> : vector<1xf32>
      %67 = vector.multi_reduction <maximumf>, %66, %cst_26 [0] : vector<8x1xf32> to vector<1xf32>
      %68 = vector.shape_cast %67 : vector<1xf32> to vector<1x1xf32>
      %69 = arith.mulf %54, %54 : vector<1x32xf32>
      %cst_27 = arith.constant dense<0.000000e+00> : vector<1xf32>
      %70 = vector.multi_reduction <add>, %69, %cst_27 [1] : vector<1x32xf32> to vector<1xf32>
      %71 = vector.shape_cast %70 : vector<1xf32> to vector<1x1xf32>
      %c0_28 = arith.constant 0 : index
      %c0_29 = arith.constant 0 : index
      %72 = vector.load %arg0[%c0_28, %c0_29] : memref<33x128xf32, #tpu.memory_space<vmem>>, vector<32x128xf32>
      %cst_30 = arith.constant dense<0.000000e+00> : vector<1x128xf32>
      %73 = tpu.matmul %54, %72, %cst_30 {dimension_numbers = #tpu.dot_dimension_numbers<[1], [0], [0], [1], [0, 0, 1, 1], [], []>} : vector<1x32xf32>, vector<32x128xf32>, vector<1x128xf32> -> vector<1x128xf32>
      %74 = vector.broadcast %71 : vector<1x1xf32> to vector<1x128xf32>
      %75 = arith.addf %74, %3 : vector<1x128xf32>
      %cst_31 = arith.constant 2.000000e+00 : f32
      %76 = vector.broadcast %cst_31 : f32 to vector<1x128xf32>
      %77 = arith.mulf %76, %73 : vector<1x128xf32>
      %78 = arith.subf %75, %77 : vector<1x128xf32>
      %cst_32 = arith.constant 0.000000e+00 : f32
      %79 = vector.broadcast %cst_32 : f32 to vector<1x128xf32>
      %80 = arith.maximumf %78, %79 : vector<1x128xf32>
      %cst_33 = arith.constant 5.000000e-01 : f32
      %81 = vector.broadcast %cst_33 : f32 to vector<1x1xf32>
      %82 = arith.cmpf ogt, %68, %81 : vector<1x1xf32>
      %83 = arith.minimumf %arg7, %80 : vector<1x128xf32>
      %84 = vector.shape_cast %82 : vector<1x1xi1> to vector<1x1xi1>
      %85 = vector.broadcast %84 : vector<1x1xi1> to vector<1x128xi1>
      %86 = arith.select %85, %83, %arg7 : vector<1x128xi1>, vector<1x128xf32>
      %87 = arith.extui %59 : vector<8x1xi1> to vector<8x1xi32>
      %88 = arith.sitofp %87 : vector<8x1xi32> to vector<8x1xf32>
      %89 = arith.maximumf %arg6, %88 : vector<8x1xf32>
      scf.yield %64, %89, %86 : vector<8x32xf32>, vector<8x1xf32>, vector<1x128xf32>
    }
    %c8_i32_15 = arith.constant 8 : i32
    %c0_i32_16 = arith.constant 0 : i32
    %c0_i32_17 = arith.constant 0 : i32
    %39:3 = scf.while (%arg4 = %c0_i32_16, %arg5 = %c0_i32_17, %arg6 = %38#0) : (i32, i32, vector<8x32xf32>) -> (i32, i32, vector<8x32xf32>) {
      %c100_i32 = arith.constant 100 : i32
      %41 = arith.cmpi slt, %arg4, %c100_i32 : i32
      %c0_i32_20 = arith.constant 0 : i32
      %42 = arith.cmpi eq, %arg5, %c0_i32_20 : i32
      %43 = arith.andi %41, %42 : i1
      scf.condition(%43) %arg4, %arg5, %arg6 : i32, i32, vector<8x32xf32>
    } do {
    ^bb0(%arg4: i32, %arg5: i32, %arg6: vector<8x32xf32>):
      %41 = arith.mulf %arg6, %arg6 : vector<8x32xf32>
      %cst_20 = arith.constant dense<0.000000e+00> : vector<8xf32>
      %42 = vector.multi_reduction <add>, %41, %cst_20 [1] : vector<8x32xf32> to vector<8xf32>
      %43 = vector.shape_cast %42 : vector<8xf32> to vector<8x1xf32>
      %c0_21 = arith.constant 0 : index
      %c0_22 = arith.constant 0 : index
      %44 = vector.load %arg0[%c0_21, %c0_22] : memref<33x128xf32, #tpu.memory_space<vmem>>, vector<32x128xf32>
      %cst_23 = arith.constant dense<0.000000e+00> : vector<8x128xf32>
      %45 = tpu.matmul %arg6, %44, %cst_23 {dimension_numbers = #tpu.dot_dimension_numbers<[1], [0], [0], [1], [0, 0, 1, 1], [], []>} : vector<8x32xf32>, vector<32x128xf32>, vector<8x128xf32> -> vector<8x128xf32>
      %46 = vector.broadcast %43 : vector<8x1xf32> to vector<8x128xf32>
      %47 = vector.broadcast %3 : vector<1x128xf32> to vector<8x128xf32>
      %48 = arith.addf %46, %47 : vector<8x128xf32>
      %cst_24 = arith.constant 2.000000e+00 : f32
      %49 = vector.broadcast %cst_24 : f32 to vector<8x128xf32>
      %50 = arith.mulf %49, %45 : vector<8x128xf32>
      %51 = arith.subf %48, %50 : vector<8x128xf32>
      %cst_25 = arith.constant 0.000000e+00 : f32
      %52 = vector.broadcast %cst_25 : f32 to vector<8x128xf32>
      %53 = arith.maximumf %51, %52 : vector<8x128xf32>
      %cst_26 = arith.constant dense<0x7F800000> : vector<128xf32>
      %54 = vector.multi_reduction <minimumf>, %53, %cst_26 [0] : vector<8x128xf32> to vector<128xf32>
      %55 = vector.shape_cast %54 : vector<128xf32> to vector<1x128xf32>
      %56 = vector.broadcast %55 : vector<1x128xf32> to vector<8x128xf32>
      %57 = arith.cmpf ole, %53, %56 : vector<8x128xf32>
      %c8_i32_27 = arith.constant 8 : i32
      %58 = vector.broadcast %c8_i32_27 : i32 to vector<8x128xi32>
      %59 = arith.select %57, %4, %58 : vector<8x128xi1>, vector<8x128xi32>
      %cst_28 = arith.constant dense<2147483647> : vector<128xi32>
      %60 = vector.multi_reduction <minsi>, %59, %cst_28 [0] : vector<8x128xi32> to vector<128xi32>
      %61 = vector.shape_cast %60 : vector<128xi32> to vector<1x128xi32>
      %62 = vector.broadcast %61 : vector<1x128xi32> to vector<8x128xi32>
      %63 = arith.cmpi eq, %4, %62 : vector<8x128xi32>
      %64 = arith.extui %63 : vector<8x128xi1> to vector<8x128xi32>
      %65 = arith.sitofp %64 : vector<8x128xi32> to vector<8x128xf32>
      %c0_29 = arith.constant 0 : index
      %c0_30 = arith.constant 0 : index
      %66 = vector.load %arg0[%c0_29, %c0_30] : memref<33x128xf32, #tpu.memory_space<vmem>>, vector<33x128xf32>
      %cst_31 = arith.constant dense<0.000000e+00> : vector<8x33xf32>
      %67 = tpu.matmul %65, %66, %cst_31 {dimension_numbers = #tpu.dot_dimension_numbers<[1], [1], [0], [0], [0, 0, 1, 0], [], []>} : vector<8x128xf32>, vector<33x128xf32>, vector<8x33xf32> -> vector<8x33xf32>
      %68 = vector.extract_strided_slice %67 {offsets = [0, 0], sizes = [8, 32], strides = [1, 1]} : vector<8x33xf32> to vector<8x32xf32>
      %69 = vector.extract_strided_slice %67 {offsets = [0, 32], sizes = [8, 1], strides = [1, 1]} : vector<8x33xf32> to vector<8x1xf32>
      %cst_32 = arith.constant 5.000000e-01 : f32
      %70 = vector.broadcast %cst_32 : f32 to vector<8x1xf32>
      %71 = arith.cmpf olt, %69, %70 : vector<8x1xf32>
      %cst_33 = arith.constant 1.000000e+00 : f32
      %72 = vector.broadcast %cst_33 : f32 to vector<8x1xf32>
      %73 = arith.maximumf %69, %72 : vector<8x1xf32>
      %74 = tpu.reciprocal %73 {approx = true} : vector<8x1xf32> -> vector<8x1xf32>
      %75 = vector.broadcast %74 : vector<8x1xf32> to vector<8x32xf32>
      %76 = arith.mulf %68, %75 : vector<8x32xf32>
      %77 = arith.subf %76, %arg6 : vector<8x32xf32>
      %78 = arith.mulf %77, %77 : vector<8x32xf32>
      %cst_34 = arith.constant 0.000000e+00 : f32
      %79 = vector.shape_cast %71 : vector<8x1xi1> to vector<8x1xi1>
      %80 = vector.broadcast %79 : vector<8x1xi1> to vector<8x32xi1>
      %81 = vector.broadcast %cst_34 : f32 to vector<8x32xf32>
      %82 = arith.select %80, %81, %78 : vector<8x32xi1>, vector<8x32xf32>
      %cst_35 = arith.constant dense<0.000000e+00> : vector<8xf32>
      %83 = vector.multi_reduction <add>, %82, %cst_35 [1] : vector<8x32xf32> to vector<8xf32>
      %84 = vector.shape_cast %83 : vector<8xf32> to vector<8x1xf32>
      %cst_36 = arith.constant dense<0.000000e+00> : vector<1xf32>
      %85 = vector.multi_reduction <add>, %84, %cst_36 [0] : vector<8x1xf32> to vector<1xf32>
      %86 = vector.shape_cast %85 : vector<1xf32> to vector<1x1xf32>
      %87 = arith.extui %71 : vector<8x1xi1> to vector<8x1xi32>
      %88 = arith.sitofp %87 : vector<8x1xi32> to vector<8x1xf32>
      %cst_37 = arith.constant dense<0xFF800000> : vector<1xf32>
      %89 = vector.multi_reduction <maximumf>, %88, %cst_37 [0] : vector<8x1xf32> to vector<1xf32>
      %90 = vector.shape_cast %89 : vector<1xf32> to vector<1x1xf32>
      %91 = vector.shape_cast %71 : vector<8x1xi1> to vector<8x1xi1>
      %92 = vector.broadcast %91 : vector<8x1xi1> to vector<8x32xi1>
      %93 = arith.select %92, %arg6, %76 : vector<8x32xi1>, vector<8x32xf32>
      %c0_38 = arith.constant 0 : index
      %c0_39 = arith.constant 0 : index
      %94 = vector.load %arg2[%c0_38, %c0_39] : memref<1x1xf32, #tpu.memory_space<vmem>>, vector<1x1xf32>
      tpu.vector_store %arg2[%c0_38, %c0_39], %86 {strides = array<i32>} : memref<1x1xf32, #tpu.memory_space<vmem>>, vector<1x1xf32>,
      %c0_40 = arith.constant 0 : index
      %c0_41 = arith.constant 0 : index
      %95 = vector.load %arg3[%c0_40, %c0_41] : memref<1x1xf32, #tpu.memory_space<vmem>>, vector<1x1xf32>
      tpu.vector_store %arg3[%c0_40, %c0_41], %90 {strides = array<i32>} : memref<1x1xf32, #tpu.memory_space<vmem>>, vector<1x1xf32>,
      %c0_42 = arith.constant 0 : index
      %c0_43 = arith.constant 0 : index
      %96 = vector.load %arg2[%c0_42, %c0_43] : memref<1x1xf32, #tpu.memory_space<vmem>>, vector<1x1xf32>
      %97 = vector.extract %96[0, 0] : f32 from vector<1x1xf32>
      %c0_44 = arith.constant 0 : index
      %c0_45 = arith.constant 0 : index
      %98 = vector.load %arg3[%c0_44, %c0_45] : memref<1x1xf32, #tpu.memory_space<vmem>>, vector<1x1xf32>
      %99 = vector.extract %98[0, 0] : f32 from vector<1x1xf32>
      %cst_46 = arith.constant 5.000000e-01 : f32
      %100 = arith.cmpf ogt, %99, %cst_46 : f32
      %101 = arith.extui %100 : i1 to i32
      %c0_i32_47 = arith.constant 0 : i32
      %102 = arith.cmpi ne, %101, %c0_i32_47 : i32
      %103 = scf.if %102 -> (vector<8x32xf32>) {
        %109 = arith.mulf %93, %93 : vector<8x32xf32>
        %cst_51 = arith.constant dense<0.000000e+00> : vector<8xf32>
        %110 = vector.multi_reduction <add>, %109, %cst_51 [1] : vector<8x32xf32> to vector<8xf32>
        %111 = vector.shape_cast %110 : vector<8xf32> to vector<8x1xf32>
        %c0_52 = arith.constant 0 : index
        %c0_53 = arith.constant 0 : index
        %112 = vector.load %arg0[%c0_52, %c0_53] : memref<33x128xf32, #tpu.memory_space<vmem>>, vector<32x128xf32>
        %cst_54 = arith.constant dense<0.000000e+00> : vector<8x128xf32>
        %113 = tpu.matmul %93, %112, %cst_54 {dimension_numbers = #tpu.dot_dimension_numbers<[1], [0], [0], [1], [0, 0, 1, 1], [], []>} : vector<8x32xf32>, vector<32x128xf32>, vector<8x128xf32> -> vector<8x128xf32>
        %114 = vector.broadcast %111 : vector<8x1xf32> to vector<8x128xf32>
        %115 = vector.broadcast %3 : vector<1x128xf32> to vector<8x128xf32>
        %116 = arith.addf %114, %115 : vector<8x128xf32>
        %cst_55 = arith.constant 2.000000e+00 : f32
        %117 = vector.broadcast %cst_55 : f32 to vector<8x128xf32>
        %118 = arith.mulf %117, %113 : vector<8x128xf32>
        %119 = arith.subf %116, %118 : vector<8x128xf32>
        %cst_56 = arith.constant 0.000000e+00 : f32
        %120 = vector.broadcast %cst_56 : f32 to vector<8x128xf32>
        %121 = arith.maximumf %119, %120 : vector<8x128xf32>
        %cst_57 = arith.constant 1.000000e+30 : f32
        %122 = vector.shape_cast %71 : vector<8x1xi1> to vector<8x1xi1>
        %123 = vector.broadcast %122 : vector<8x1xi1> to vector<8x128xi1>
        %124 = vector.broadcast %cst_57 : f32 to vector<8x128xf32>
        %125 = arith.select %123, %124, %121 : vector<8x128xi1>, vector<8x128xf32>
        %cst_58 = arith.constant dense<0x7F800000> : vector<128xf32>
        %126 = vector.multi_reduction <minimumf>, %125, %cst_58 [0] : vector<8x128xf32> to vector<128xf32>
        %127 = vector.shape_cast %126 : vector<128xf32> to vector<1x128xf32>
        %cst_59 = arith.constant 0.000000e+00 : f32
        %cst_60 = arith.constant 1.000000e+00 : f32
        %128 = vector.broadcast %cst_59 : f32 to vector<8x1xf32>
        %129 = vector.broadcast %cst_60 : f32 to vector<8x1xf32>
        %130 = arith.select %71, %128, %129 : vector<8x1xi1>, vector<8x1xf32>
        %c0_i32_61 = arith.constant 0 : i32
        %c8_i32_62 = arith.constant 8 : i32
        %131 = arith.addi %c0_i32_61, %c8_i32_62 : i32
        %c1_i32_63 = arith.constant 1 : i32
        %132:3 = scf.for %arg7 = %c0_i32_61 to %131 step %c1_i32_63 iter_args(%arg8 = %93, %arg9 = %130, %arg10 = %127) -> (vector<8x32xf32>, vector<8x1xf32>, vector<1x128xf32>)  : i32 {
          %cst_65 = arith.constant dense<0xFF800000> : vector<1xf32>
          %133 = vector.multi_reduction <maximumf>, %arg10, %cst_65 [1] : vector<1x128xf32> to vector<1xf32>
          %134 = vector.shape_cast %133 : vector<1xf32> to vector<1x1xf32>
          %135 = vector.broadcast %134 : vector<1x1xf32> to vector<1x128xf32>
          %136 = arith.cmpf oge, %arg10, %135 : vector<1x128xf32>
          %c128_i32 = arith.constant 128 : i32
          %137 = vector.broadcast %c128_i32 : i32 to vector<1x128xi32>
          %138 = arith.select %136, %5, %137 : vector<1x128xi1>, vector<1x128xi32>
          %cst_66 = arith.constant dense<2147483647> : vector<1xi32>
          %139 = vector.multi_reduction <minsi>, %138, %cst_66 [1] : vector<1x128xi32> to vector<1xi32>
          %140 = vector.shape_cast %139 : vector<1xi32> to vector<1x1xi32>
          %141 = vector.broadcast %140 : vector<1x1xi32> to vector<1x128xi32>
          %142 = arith.cmpi eq, %5, %141 : vector<1x128xi32>
          %143 = arith.extui %142 : vector<1x128xi1> to vector<1x128xi32>
          %144 = arith.sitofp %143 : vector<1x128xi32> to vector<1x128xf32>
          %c0_67 = arith.constant 0 : index
          %c0_68 = arith.constant 0 : index
          %145 = vector.load %arg0[%c0_67, %c0_68] : memref<33x128xf32, #tpu.memory_space<vmem>>, vector<32x128xf32>
          %cst_69 = arith.constant dense<0.000000e+00> : vector<1x32xf32>
          %146 = tpu.matmul %144, %145, %cst_69 {dimension_numbers = #tpu.dot_dimension_numbers<[1], [1], [0], [0], [0, 0, 1, 0], [], []>} : vector<1x128xf32>, vector<32x128xf32>, vector<1x32xf32> -> vector<1x32xf32>
          %147 = vector.broadcast %arg7 : i32 to vector<8x1xi32>
          %148 = arith.cmpi eq, %6, %147 : vector<8x1xi32>
          %cst_70 = arith.constant 5.000000e-01 : f32
          %149 = vector.broadcast %cst_70 : f32 to vector<8x1xf32>
          %150 = arith.cmpf olt, %arg9, %149 : vector<8x1xf32>
          %151 = arith.andi %148, %150 : vector<8x1xi1>
          %152 = vector.shape_cast %151 : vector<8x1xi1> to vector<8x1xi1>
          %153 = vector.broadcast %152 : vector<8x1xi1> to vector<8x32xi1>
          %154 = vector.shape_cast %146 : vector<1x32xf32> to vector<1x32xf32>
          %155 = vector.broadcast %154 : vector<1x32xf32> to vector<8x32xf32>
          %156 = arith.select %153, %155, %arg8 : vector<8x32xi1>, vector<8x32xf32>
          %157 = arith.extui %151 : vector<8x1xi1> to vector<8x1xi32>
          %158 = arith.sitofp %157 : vector<8x1xi32> to vector<8x1xf32>
          %cst_71 = arith.constant dense<0xFF800000> : vector<1xf32>
          %159 = vector.multi_reduction <maximumf>, %158, %cst_71 [0] : vector<8x1xf32> to vector<1xf32>
          %160 = vector.shape_cast %159 : vector<1xf32> to vector<1x1xf32>
          %161 = arith.mulf %146, %146 : vector<1x32xf32>
          %cst_72 = arith.constant dense<0.000000e+00> : vector<1xf32>
          %162 = vector.multi_reduction <add>, %161, %cst_72 [1] : vector<1x32xf32> to vector<1xf32>
          %163 = vector.shape_cast %162 : vector<1xf32> to vector<1x1xf32>
          %c0_73 = arith.constant 0 : index
          %c0_74 = arith.constant 0 : index
          %164 = vector.load %arg0[%c0_73, %c0_74] : memref<33x128xf32, #tpu.memory_space<vmem>>, vector<32x128xf32>
          %cst_75 = arith.constant dense<0.000000e+00> : vector<1x128xf32>
          %165 = tpu.matmul %146, %164, %cst_75 {dimension_numbers = #tpu.dot_dimension_numbers<[1], [0], [0], [1], [0, 0, 1, 1], [], []>} : vector<1x32xf32>, vector<32x128xf32>, vector<1x128xf32> -> vector<1x128xf32>
          %166 = vector.broadcast %163 : vector<1x1xf32> to vector<1x128xf32>
          %167 = arith.addf %166, %3 : vector<1x128xf32>
          %cst_76 = arith.constant 2.000000e+00 : f32
          %168 = vector.broadcast %cst_76 : f32 to vector<1x128xf32>
          %169 = arith.mulf %168, %165 : vector<1x128xf32>
          %170 = arith.subf %167, %169 : vector<1x128xf32>
          %cst_77 = arith.constant 0.000000e+00 : f32
          %171 = vector.broadcast %cst_77 : f32 to vector<1x128xf32>
          %172 = arith.maximumf %170, %171 : vector<1x128xf32>
          %cst_78 = arith.constant 5.000000e-01 : f32
          %173 = vector.broadcast %cst_78 : f32 to vector<1x1xf32>
          %174 = arith.cmpf ogt, %160, %173 : vector<1x1xf32>
          %175 = arith.minimumf %arg10, %172 : vector<1x128xf32>
          %176 = vector.shape_cast %174 : vector<1x1xi1> to vector<1x1xi1>
          %177 = vector.broadcast %176 : vector<1x1xi1> to vector<1x128xi1>
          %178 = arith.select %177, %175, %arg10 : vector<1x128xi1>, vector<1x128xf32>
          %179 = arith.extui %151 : vector<8x1xi1> to vector<8x1xi32>
          %180 = arith.sitofp %179 : vector<8x1xi32> to vector<8x1xf32>
          %181 = arith.maximumf %arg9, %180 : vector<8x1xf32>
          scf.yield %156, %181, %178 : vector<8x32xf32>, vector<8x1xf32>, vector<1x128xf32>
        }
        %c8_i32_64 = arith.constant 8 : i32
        scf.yield %132#0 : vector<8x32xf32>
      } else {
        scf.yield %93 : vector<8x32xf32>
      }
      %cst_48 = arith.constant 9.99999974E-5 : f32
      %104 = arith.cmpf ole, %97, %cst_48 : f32
      %cst_49 = arith.constant 5.000000e-01 : f32
      %105 = arith.cmpf olt, %99, %cst_49 : f32
      %106 = arith.andi %104, %105 : i1
      %107 = arith.extui %106 : i1 to i32
      %c1_i32_50 = arith.constant 1 : i32
      %108 = arith.addi %arg4, %c1_i32_50 : i32
      scf.yield %108, %107, %103 : i32, i32, vector<8x32xf32>
    }
    %c0_18 = arith.constant 0 : index
    %c0_19 = arith.constant 0 : index
    %40 = vector.load %arg1[%c0_18, %c0_19] : memref<8x32xf32, #tpu.memory_space<vmem>>, vector<8x32xf32>
    tpu.vector_store %arg1[%c0_18, %c0_19], %39#2 {strides = array<i32>} : memref<8x32xf32, #tpu.memory_space<vmem>>, vector<8x32xf32>,
    return
  }
}

</mosaic_0001>

<bundles_post_ra>
// kernel: tpu_custom_call.1
= control target key start
LH: loop header
LB: loop body
LE: loop exit
PB: predicated region body
PF: predicated region fallthrough
CT: control target
= control target key end

     0   :  { %6 = vsyncpa [#allocation5], 0  ;;  %s1877_s0 = inlined_call_operand.hbm [shape: f32[33,128], index: 0, kind: input, shape index: {}]   ;;  %s1878_s1 = inlined_call_operand.hbm [shape: f32[8,32], index: 1, kind: output, shape index: {}]  }
   0x1   :  { %7 = vsyncpa [#allocation6], 0  ;;  %s1619_s6 = smov [#allocation4]   ;;  %s1483_s10 = scalar_lea.hbm %s1877_s0, 640 }
   0x2   :  { %s13_s7 = sshll.u32 %s1619_s6, 4  ;;  %p1484_p0 = scmp.ne.s32.totalorder %s1877_s0, %s1483_s10  ;;  %s14_s7 = int_to_ptr.vmem [resolvable:$true] %s13_s7 }
   0x3   :  { %p1487_p1 = scmp.lt.u32.totalorder %s1483_s10, %s1877_s0 }
   0x5   :  { %p1489_p2 = pnand %p1487_p1, %p1484_p0 }
   0x7   :  { %1492 = shalt.err (!%p1489_p2)
}
   0x8   :  { %s1493_s15 = scalar_lea.vmem %s14_s7, 640  ;;  %p1498_p4 = scmp.lt.s32.totalorder %s14_s7, %s14_s7 }
   0x9   :  { %p1494_p3 = scmp.ne.s32.totalorder %s14_s7, %s1493_s15  ;;  %p1499_p5 = scmp.lt.s32.totalorder %s1493_s15, %s1493_s15 }
   0xb   :  { %p1500_p6 = por %p1499_p5, %p1498_p4 }
   0xd   :  { %p1501_p7 = pnand %p1500_p6, %p1494_p3 }
   0xf   :  { %1504 = shalt.err (!%p1501_p7)
}
  0x10   :  { %s1620_s16 = smov 128   ;;  %s1621_s17 = smov 8  }
  0x11   :  { %19 = dma.hbm_to_vmem [thread:$0]  %s1877_s0, 640, %s14_s7, [#allocation5], %s1620_s16, %s1620_s16, %s1621_s17  }
  0x12   :  { %1571 = dma.done.wait [#allocation5], 640  }
  0x13   :  { %1572 = vsyncadd [#allocation5], 4294966656  ;;  %v1622_v0 = vmov 0.0|0.0   ;;  %vm1623_vm0 = vmmov 0   ;;  %v1624_v1 = vmov 0.0   ;;  %v23_v2 = vld [vmem:[#allocation4] sm:$0xff]  ;;  %v105_v14 = vlaneseq }
  0x14   :  { %1296 = vmatprep.subr.bf16.mxu1 %v1622_v0  ;;  %1197 = vmatprep.mubr.msk.f32.mxu1 %vm1623_vm0, %v1624_v1  ;;  %v24_v3 = vld [vmem:[#allocation4 + $0x8] sm:$0xff]  ;;  %v25_v4 = vld [vmem:[#allocation4 + $0x10] sm:$0xff]  ;;  %v26_v6 = vld [vmem:[#allocation4 + $0x18] sm:$0xff]  ;;  %v27_v7 = vmul.f32 %v23_v2, %v23_v2  ;;  %vm31_vm1 = vcmask 261120   ;;  %v1625_v16 = vmov 1.0   ;;  %vm192_vm4 = vcmask 253952  }
  0x15   :  { %1290 = vmatprep.subr.bf16.mxu0 %v1622_v0  ;;  %1186 = vmatprep.mubr.msk.f32.mxu0 %vm1623_vm0, %v1624_v1  ;;  %v1297_v5 = vpack.c.bf16 %v24_v3, %v23_v2  ;;  %v28_v8 = vmul.f32 %v24_v3, %v24_v3  ;;  %v29_v9 = vmul.f32 %v25_v4, %v25_v4  ;;  %v1672_v15 = vand.u32 127, %v105_v14  ;;  %s1695_s0 = smov 0  }
  0x16   :  { %v30_v10 = vmul.f32 %v26_v6, %v26_v6  ;;  %v1300_v13 = vpack.c.bf16 %v26_v6, %v25_v4  ;;  %v1677_v17 = vshrl.u32 %v105_v14, 7 }
  0x17   :  { %1298 = vmatpush3.bf16.xpose.msra.mxu1 %v1297_v5  ;;  %v1291_v11 = vpack.c.bf16 %v28_v8, %v27_v7  ;;  %vm109_vm2 = vcmp.eq.s32.totalorder %v1672_v15, 0 }
  0x18   :  { %1299 = vmatprep.subr.bf16.mxu1 %v1622_v0  ;;  %v1294_v12 = vpack.c.bf16 %v30_v10, %v29_v9  ;;  %vm182_vm3 = vcmp.eq.s32.totalorder %v1677_v17, 0  ;;  %v1683_v21 = vsub.s32 0, %v1677_v17 }
  0x19   :  { %1292 = vmatpush3.bf16.msra.mxu0 %v1291_v11  ;;  %v1111_v18 = vsel %vm182_vm3, 1.0, %v1624_v1  }
  0x1a   :  { %1293 = vmatprep.subr.bf16.mxu0 %v1622_v0 }
  0x1d   :  { %1295 = vmatpush3.bf16.msra.mxu0 %v1294_v12 }
  0x1e   :  { %1302 = vmatprep.subr.bf16.mxu0 %v1622_v0 }
  0x1f   :  { %1301 = vmatpush3.bf16.xpose.msra.mxu1 %v1300_v13 }
  0x20   :  { %1187 = vmatmul.mubr.msk.f32.vlgmr.msra.gmra.mrb[0].mxu0 %vm31_vm1, %v1625_v16 }
  0x21   :  { %1304 = vmatpush3.bf16.msra.mxu0 %v1297_v5  ;;  %1208 = vmatprep.mubr.msk.f32.mxu0 %vm1623_vm0, %v1624_v1 }
  0x22   :  { %1305 = vmatprep.subr.bf16.mxu0 %v1622_v0 }
  0x25   :  { %1307 = vmatpush3.bf16.msra.mxu0 %v1300_v13 }
  0x26   :  { %1198 = vmatmul.mubr.msk.f32.vlgmr.msra.gmra.mrb[0].mxu1 %vm109_vm2, %v1625_v16 }
  0xf3   :  { %v1680_v19 = vpop.f32.mrb[0].mxu0 }
  0xf4   :  { %v1188_v20 = vpop.f32.mrb[1].mxu0 }
  0xf9   :  { %v178_v22 = vpop.f32.mrb[0].mxu1 }
  0xfa   :  { %v188_v23 = vrot.slane %v178_v22, %v1683_v21  ;;  %v1199_v24 = vpop.f32.mrb[1].mxu1  ;;  %1209 = vmatmul.mubr.msk.f32.vlgmr.msra.gmra.mrb[2].mxu0 %vm31_vm1, %v178_v22  ;;  %v191_v25 = vmul.f32 %v178_v22, %v178_v22 }
  0xfc   :  { %v189_v26 = vsel %vm182_vm3, %v188_v23, 0.0   ;;  %v193_v27 = vsel %vm192_vm4, %v191_v25, 0.0 }
  0xfd   :  { %194 = vadd.xlane.f32.xlu0 %v193_v27 }
 0x18a   :  { %v195_v28 = vpop.xlane.xlu0 %194 }
 0x18b   :  { %v269_v30 = vadd.f32 %v195_v28, %v1680_v19 }
 0x1cd   :  { %v265_v29 = vpop.f32.mrb[2].mxu0 }
 0x1ce   :  { %v270_v31 = vmul.f32 2.0, %v265_v29  ;;  %v1210_v32 = vpop.f32.mrb[3].mxu0 }
 0x1d0   :  { %v271_v33 = vsub.f32 %v269_v30, %v270_v31 }
 0x1d2   :  { %v272_v34 = vmax.f32 %v271_v33, 0.0  }
 0x1d3 LB: > { %vm282_vm5 = vcmask 1040384   ;;  %v306_v41 = vld [vmem:[#allocation4] sm:$0xff]  ;;  %v307_v42 = vld [vmem:[#allocation4 + $0x8] sm:$0xff]  ;;  %v1626_v43 = vmov 0.0|0.0   ;;  %v308_v45 = vld [vmem:[#allocation4 + $0x10] sm:$0xff]  ;;  %vm1627_vm8 = vmmov 0   ;;  %v380_v53 = vstv %s1589_s0  ;;  %s1589_s0 = sphi %s1695_s0, %s278_s0   ;;  %v1585_v26 = vphi %v189_v26, %v1881_v26   ;;  %v1581_v18 = vphi %v1111_v18, %v484_v18   ;;  %v1577_v34 = vphi %v272_v34, %v483_v34  }
 0x1d4   : > { %v283_v35 = vsel %vm282_vm5, %v1577_v34, -inf  ;;  %1308 = vmatprep.subr.bf16.mxu0 %v1626_v43  ;;  %v1309_v44 = vpack.c.bf16 %v307_v42, %v306_v41  ;;  %1314 = vmatprep.subr.bf16.mxu1 %v1626_v43  ;;  %v309_v46 = vld [vmem:[#allocation4 + $0x18] sm:$0xff]  ;;  %v1628_v52 = vmov 0.0   ;;  %vm382_vm9 = vcmp.lt.f32.partialorder %v1581_v18, 0.5  ;;  %s278_s0 = sadd.s32 1, %s1589_s0  }
 0x1d5   : > { %284 = vmax.xlane.f32.xlu0 %v283_v35  ;;  %v1312_v47 = vpack.c.bf16 %v309_v46, %v308_v45  ;;  %1219 = vmatprep.mubr.msk.f32.mxu0 %vm1627_vm8, %v1628_v52  ;;  %vm381_vm10 = vcmp.eq.s32.totalorder %v1677_v17, %v380_v53  ;;  %v1629_v61 = vmov 1.0   ;;  %p275_p8 = scmp.ge.s32.totalorder %s278_s0, 8  }
 0x1d6   : > { %1310 = vmatpush3.bf16.xpose.msra.mxu0 %v1309_v44  ;;  %1316 = vmatpush3.bf16.msra.mxu1 %v1309_v44  ;;  %vm1715_vm11 = vmand %vm381_vm10, %vm382_vm9  ;;  %s1742_s20 = smov (%p275_p8), 0  }
 0x1d7   : > { %1311 = vmatprep.subr.bf16.mxu0 %v1626_v43  ;;  %1317 = vmatprep.subr.bf16.mxu1 %v1626_v43  ;;  %v1115_v55 = vsel %vm1715_vm11, 1.0, %v1628_v52 }
 0x1d8   : > { %1230 = vmatprep.mubr.msk.f32.mxu1 %vm1627_vm8, %v1628_v52  ;;  %v484_v18 = vmax.f32 %v1581_v18, %v1115_v55   ;;  %v392_v4 = vrot.slane %v1115_v55, 4 }
 0x1da   : > { %1319 = vmatpush3.bf16.msra.mxu1 %v1312_v47  ;;  %v393_v5 = vmax.f32 %v1115_v55, %v392_v4 }
 0x1dc   : > { %v394_v6 = vrot.slane %v393_v5, 2 }
 0x1de   : > { %1313 = vmatpush3.bf16.xpose.msra.mxu0 %v1312_v47  ;;  %v395_v7 = vmax.f32 %v393_v5, %v394_v6 }
 0x1e0   : > { %v396_v8 = vrot.slane %v395_v7, 1 }
 0x1e2   : > { %v397_v14 = vmax.f32 %v395_v7, %v396_v8 }
 0x1e4   : > { %vm479_vm13 = vcmp.gt.f32.partialorder %v397_v14, 0.5 }
 0x262   : > { %v285_v36 = vpop.xlane.xlu0 %284 }
 0x263   : > { %vm286_vm6 = vcmp.ge.f32.partialorder %v1577_v34, %v285_v36 }
 0x264   : > { %v287_v37 = vsel %vm286_vm6, %v1672_v15, 128 }
 0x265   : > { %v288_v38 = vsel %vm282_vm5, %v287_v37, 2147483647 }
 0x266   : > { %v290_v39 = vshra.s32 %v288_v38, 16  ;;  %v289_v48 = vand.u32 65535, %v288_v38 }
 0x268   : > { %v292_v40 = vcvt.s32.f32 %v290_v39  ;;  %v291_v50 = vcvt.s32.f32 %v289_v48 }
 0x26a   : > { %293 = vmin.xlane.f32.xlu0 %v292_v40 }
 0x2f7   : > { %v294_v49 = vpop.xlane.xlu0 %293 }
 0x2f8   : > { %vm295_vm7 = vcmp.eq.f32.partialorder %v292_v40, %v294_v49  ;;  %v300_v56 = vcvt.f32.s32 %v294_v49 }
 0x2f9   : > { %v296_v51 = vsel %vm295_vm7, %v291_v50, inf }
 0x2fa   : > { %297 = vmin.xlane.f32.xlu1 %v296_v51  ;;  %v301_v58 = vshll.u32 %v300_v56, 16 }
 0x387   : > { %v298_v57 = vpop.xlane.xlu1 %297 }
 0x388   : > { %v299_v59 = vcvt.f32.s32 %v298_v57 }
 0x38a   : > { %v302_v60 = vadd.s32 %v301_v58, %v299_v59 }
 0x38c   : > { %vm303_vm12 = vcmp.eq.s32.totalorder %v1672_v15, %v302_v60 }
 0x38d   : > { %1220 = vmatmul.mubr.msk.f32.vlgmr.msra.gmra.mrb[0].mxu0 %vm303_vm12, %v1629_v61 }
 0x460   : > { %v376_v62 = vpop.f32.mrb[0].mxu0 }
 0x461   : > { %v389_v63 = vrot.slane %v376_v62, %v1683_v21  ;;  %v1221_v0 = vpop.f32.mrb[1].mxu0  ;;  %1231 = vmatmul.mubr.msk.f32.vlgmr.msra.gmra.mrb[0].mxu1 %vm31_vm1, %v376_v62  ;;  %v398_v1 = vmul.f32 %v376_v62, %v376_v62 }
 0x463   : > { %v390_v2 = vsel %vm1715_vm11, %v389_v63, %v1585_v26   ;;  %v399_v3 = vsel %vm192_vm4, %v398_v1, 0.0 }
 0x464   : > { %400 = vadd.xlane.f32.xlu1 %v399_v3  ;;  %v1881_v26 = vmov %v390_v2 }
 0x4f1   : > { %v401_v9 = vpop.xlane.xlu1 %400 }
 0x4f2   : > { %v475_v11 = vadd.f32 %v401_v9, %v1680_v19 }
 0x534   : > { %v471_v10 = vpop.f32.mrb[0].mxu1 }
 0x535   : > { %v476_v12 = vmul.f32 2.0, %v471_v10  ;;  %v1232_v13 = vpop.f32.mrb[1].mxu1 }
 0x537   : > { %v477_v16 = vsub.f32 %v475_v11, %v476_v12  ;;  %277 = sbr.rel (!%p275_p8) target bundleno = 467 (0x1d3), region = 57 }
 0x539   : > { %v478_v20 = vmax.f32 %v477_v16, 0.0 }
 0x53b   : > { %v480_v22 = vmin.f32 %v1577_v34, %v478_v20 }
 0x53d   : > { %v483_v34 = vsel %vm479_vm13, %v480_v22, %v1577_v34  }
 0x53e LB: > { %v499_v23 = vld [vmem:[#allocation4] sm:$0xff]  ;;  %v500_v24 = vld [vmem:[#allocation4 + $0x8] sm:$0xff]  ;;  %v501_v25 = vld [vmem:[#allocation4 + $0x10] sm:$0xff]  ;;  %v1630_v26 = vmov 0.0|0.0   ;;  %vm1631_vm14 = vmmov 0   ;;  %v1632_v18 = vmov 0.0   ;;  %v495_v29 = vmul.f32 %v1593_v2, %v1593_v2  ;;  %s1597_s20 = sphi %s1742_s20, %s1052_s20   ;;  %v1593_v2 = vphi %v390_v2, %v1885_v2  }
 0x53f   : > { %1320 = vmatprep.subr.bf16.mxu0 %v1630_v26  ;;  %v1321_v27 = vpack.c.bf16 %v500_v24, %v499_v23  ;;  %v502_v28 = vld [vmem:[#allocation4 + $0x18] sm:$0xff]  ;;  %1241 = vmatprep.mubr.msk.f32.mxu0 %vm1631_vm14, %v1632_v18  ;;  %v608_v32 = vld [vmem:[#allocation4 + $0x20] sm:$0x1]  ;;  %v1757_v33 = vrot.slane %v1680_v19, %v1683_v21  ;;  %v1633_v54 = vmov 1.0   ;;  %v1634_v55 = vmov 32   ;;  %s1636_s21 = smov 96  }
 0x540   : > { %1326 = vmatprep.subr.bf16.mxu1 %v1630_v26  ;;  %1254 = vmatprep.mubr.msk.f32.mxu1 %vm1631_vm14, %v1632_v18  ;;  %v1324_v30 = vpack.c.bf16 %v502_v28, %v501_v25  ;;  %v496_v31 = vsel %vm31_vm1, %v495_v29, 0.0  ;;  %v1635_v59 = vmov 0   ;;  %vm706_vm8 = vcmask 269568  }
 0x541   : > { %1322 = vmatpush3.bf16.msra.mxu0 %v1321_v27  ;;  %1328 = vmatpush3.bf16.xpose.msra.mxu1 %v1321_v27  ;;  %vm715_vm10 = vcmask 0  }
 0x542   : > { %1323 = vmatprep.subr.bf16.mxu0 %v1630_v26  ;;  %1329 = vmatprep.subr.bf16.mxu1 %v1630_v26 }
 0x543   : > { %497 = vadd.xlane.f32.xlu0 %v496_v31  ;;  %1478 = vset.pattern.permute.xlu1 %v1634_v55 }
 0x544   : > { %1477 = vset.pattern.permute.xlu0 %v1634_v55 }
 0x545   : > { %1325 = vmatpush3.bf16.msra.mxu0 %v1324_v30 }
 0x548   : > { %1242 = vmatmul.mubr.msk.f32.vlgmr.msra.gmra.mrb[0].mxu0 %vm31_vm1, %v1593_v2 }
 0x549   : > { %1331 = vmatpush3.bf16.xpose.msra.mxu1 %v1324_v30 }
 0x54a   : > { %1252 = vmatprep.subr.mxu1 %v1632_v18 }
 0x551   : > { %1253 = vmatpush3.xpose.msra.mxu1 %v608_v32 }
 0x5d0   : > { %v498_v34 = vpop.xlane.xlu0 %497 }
 0x5d1   : > { %v580_v35 = vadd.f32 %v1757_v33, %v498_v34 }
 0x61b   : > { %v572_v36 = vpop.f32.mrb[0].mxu0 }
 0x61c   : > { %v581_v37 = vmul.f32 2.0, %v572_v36  ;;  %v1243_v38 = vpop.f32.mrb[1].mxu0 }
 0x61e   : > { %v582_v39 = vsub.f32 %v580_v35, %v581_v37 }
 0x620   : > { %v583_v40 = vmax.f32 %v582_v39, 0.0 }
 0x622   : > { %v584_v41 = vrot.slane %v583_v40, 4 }
 0x624   : > { %v585_v42 = vmin.f32 %v583_v40, %v584_v41 }
 0x626   : > { %v586_v43 = vrot.slane %v585_v42, 2 }
 0x628   : > { %v587_v44 = vmin.f32 %v585_v42, %v586_v43 }
 0x62a   : > { %v588_v45 = vrot.slane %v587_v44, 1 }
 0x62c   : > { %v589_v46 = vmin.f32 %v587_v44, %v588_v45 }
 0x62e   : > { %vm590_vm15 = vcmp.le.f32.partialorder %v583_v40, %v589_v46 }
 0x62f   : > { %v591_v47 = vsel %vm590_vm15, %v1677_v17, 8 }
 0x630   : > { %v592_v48 = vrot.slane %v591_v47, 4 }
 0x632   : > { %vm593_vm0 = vcmp.lt.s32.totalorder %v591_v47, %v592_v48 }
 0x633   : > { %v594_v49 = vsel %vm593_vm0, %v591_v47, %v592_v48 }
 0x634   : > { %v595_v50 = vrot.slane %v594_v49, 2 }
 0x636   : > { %vm596_vm2 = vcmp.lt.s32.totalorder %v594_v49, %v595_v50 }
 0x637   : > { %v597_v51 = vsel %vm596_vm2, %v594_v49, %v595_v50 }
 0x638   : > { %v598_v52 = vrot.slane %v597_v51, 1 }
 0x63a   : > { %vm599_vm3 = vcmp.lt.s32.totalorder %v597_v51, %v598_v52 }
 0x63b   : > { %v600_v53 = vsel %vm599_vm3, %v597_v51, %v598_v52 }
 0x63c   : > { %vm601_vm6 = vcmp.eq.s32.totalorder %v1677_v17, %v600_v53 }
 0x63d   : > { %1255 = vmatmul.mubr.msk.f32.vlgmr.msra.gmra.mrb[0].mxu1 %vm601_vm6, %v1633_v54 }
 0x710   : > { %v1762_v56 = vpop.f32.mrb[0].mxu1 }
 0x711   : > { %v680_v57 = vmax.f32 %v1762_v56, 1.0  ;;  %v1256_v58 = vpop.f32.mrb[1].mxu1  ;;  %vm679_vm7 = vcmp.lt.f32.partialorder %v1762_v56, 0.5 }
 0x712   : > { %v690_v60 = vsel %vm679_vm7, 1, %v1635_v59  ;;  %v1120_v62 = vsel %vm679_vm7, 1.0, %v1632_v18  ;;  %v1789_v18 = vmov 0  }
 0x713   : > { %1479 = vrcp.f32 %v680_v57  ;;  %692 = vperm.xlu1 %1478, %v690_v60   ;;  %v707_v1 = vsel %vm706_vm8, %v1120_v62, -inf }
 0x714   : > { %v708_v6 = vrot.slane %v707_v1, 4 }
 0x716   : > { %v709_v9 = vmax.f32 %v707_v1, %v708_v6 }
 0x718   : > { %v710_v11 = vrot.slane %v709_v9, 2 }
 0x71a   : > { %v711_v12 = vmax.f32 %v709_v9, %v710_v11 }
 0x71c   : > { %v712_v13 = vrot.slane %v711_v12, 1 }
 0x71d   : > { %v1480_v61 = vpop.eup %1479 }
 0x71e   : > { %684 = vperm.xlu0 %1477, %v1480_v61   ;;  %v713_v14 = vmax.f32 %v711_v12, %v712_v13 }
 0x792   : > { %v1770_v63 = vpop.permute.xlu1 %692 }
 0x793   : > { %vm694_vm9 = vcmp.eq.s32.totalorder %v1770_v63, 1 }
 0x79d   : > { %v685_v0 = vpop.permute.xlu0 %684 }
 0x79e   : > { %v687_v3 = vmul.f32 %v685_v0, %v1762_v56 }
 0x7a0   : > { %v688_v4 = vsub.f32 %v687_v3, %v1593_v2  ;;  %v1779_v5 = vsel %vm694_vm9, %v1593_v2, %v687_v3  }
 0x7a2   : > { %v689_v7 = vmul.f32 %v688_v4, %v688_v4 }
 0x7a4   : > { %v695_v8 = vsel %vm694_vm9, 0.0, %v689_v7 }
 0x7a5   : > { %v696_v10 = vsel %vm31_vm1, %v695_v8, 0.0 }
 0x7a6   : > { %697 = vadd.xlane.f32.xlu1 %v696_v10 }
 0x7b7   : > { %718 = vrot.lane.b32.xlu1 %v713_v14, %s1636_s21 }
 0x833   : > { %v698_v16 = vpop.xlane.xlu1 %697 }
 0x834   : > { %v699_v20 = vrot.slane %v698_v16, 4 }
 0x836   : > { %v700_v2 = vadd.f32 %v699_v20, %v698_v16 }
 0x837   : > { %v719_v22 = vpop.permute.xlu1 %718 }
 0x838   : > { %v701_v23 = vrot.slane %v700_v2, 2  ;;  %721 = vst.msk [vmem:[#allocation3] sm:$0x1] %vm715_vm10, %v719_v22 }
 0x83a   : > { %v702_v24 = vadd.f32 %v701_v23, %v700_v2 }
 0x83c   : > { %v703_v25 = vrot.slane %v702_v24, 1 }
 0x83e   : > { %v704_v26 = vadd.f32 %v703_v25, %v702_v24 }
 0x83f   : > { %v724_v28 = vld [vmem:[#allocation3] sm:$0x1] }
 0x840   : > { %716 = vst.msk [vmem:[#allocation2] sm:$0x1] %vm715_vm10, %v704_v26 }
 0x847   : > { %v722_v27 = vld [vmem:[#allocation2] sm:$0x1] }
 0x848   : > { %1350 = vpush %v722_v27 }
 0x849   : > { %1352 = vpush %v724_v28 }
 0x879   : > { %s1784_s22 = spop %1350 }
 0x87a   : > { %s1786_s23 = spop %1352 }
 0x87b   : > { %p726_p9 = scmp.gt.f32.partialorder %s1786_s23, 0.5 }
 0x87c   : > { %v734_v29 = vld [vmem:[#allocation4] sm:$0xff] (%p726_p9)  ;;  %v735_v30 = vld [vmem:[#allocation4 + $0x8] sm:$0xff] (%p726_p9)  ;;  %v736_v31 = vld [vmem:[#allocation4 + $0x10] sm:$0xff] (%p726_p9)  ;;  %v730_v32 = vmul.f32 (%p726_p9), %v1779_v5, %v1779_v5  ;;  %v1637_v34 = vmov (%p726_p9), 0.0|0.0   ;;  %vm1638_vm11 = vmmov (%p726_p9), 0   ;;  %v1639_v37 = vmov (%p726_p9), 0.0  }
 0x87d   : > { %729 = sbr.rel (!%p726_p9) target bundleno = 3286 (0xcd6), region = 27  ;;  %1332 = vmatprep.subr.bf16.mxu0 (%p726_p9), %v1637_v34  ;;  %v1333_v35 = vpack.c.bf16 (%p726_p9), %v735_v30, %v734_v29  ;;  %v737_v36 = vld [vmem:[#allocation4 + $0x18] sm:$0xff] (%p726_p9)  ;;  %1265 = vmatprep.mubr.msk.f32.mxu0 (%p726_p9), %vm1638_vm11, %v1639_v37  ;;  %v1640_v40 = vmov (%p726_p9), 1.0   ;;  %s1810_s24 = smov (%p726_p9), 0  }
 0x87e   : > { %v731_v38 = vsel (%p726_p9), %vm31_vm1, %v730_v32, 0.0  ;;  %v1336_v39 = vpack.c.bf16 (%p726_p9), %v737_v36, %v736_v31  ;;  %v822_v41 = vsel (%p726_p9), %vm679_vm7, 0.0, %v1640_v40  }
 0x87f   : > { %1334 = vmatpush3.bf16.msra.mxu0 (%p726_p9), %v1333_v35  ;;  %732 = vadd.xlane.f32.xlu0 (%p726_p9), %v731_v38 }
 0x880   : > { %1335 = vmatprep.subr.bf16.mxu0 (%p726_p9), %v1637_v34 }
 0x883   : > { %1337 = vmatpush3.bf16.msra.mxu0 (%p726_p9), %v1336_v39 }
 0x886   : > { %1266 = vmatmul.mubr.msk.f32.vlgmr.msra.gmra.mrb[0].mxu0 %vm31_vm1, %v1779_v5 }
 0x90c   : > { %v733_v42 = vpop.xlane.xlu0 %732 }
 0x90d   : > { %v811_v43 = vadd.f32 %v733_v42, %v1757_v33  ;;  %v1882_v33 = vmov %v1779_v5 }
 0x959   : > { %v807_v44 = vpop.f32.mrb[0].mxu0 }
 0x95a   : > { %v812_v45 = vmul.f32 2.0, %v807_v44  ;;  %v1267_v46 = vpop.f32.mrb[1].mxu0 }
 0x95c   : > { %v813_v47 = vsub.f32 %v811_v43, %v812_v45 }
 0x95e   : > { %v814_v48 = vmax.f32 %v813_v47, 0.0 }
 0x960   : > { %v815_v49 = vsel %vm694_vm9, 1e+30, %v814_v48 }
 0x961   : > { %v816_v50 = vrot.slane %v815_v49, 4 }
 0x963   : > { %v817_v51 = vmin.f32 %v815_v49, %v816_v50 }
 0x965   : > { %v818_v52 = vrot.slane %v817_v51, 2 }
 0x967   : > { %v819_v53 = vmin.f32 %v817_v51, %v818_v52 }
 0x969   : > { %v820_v54 = vrot.slane %v819_v53, 1 }
 0x96b   : > { %v821_v55 = vmin.f32 %v819_v53, %v820_v54  }
 0x96c LB: >> { %v833_v56 = vsel %vm282_vm5, %v1601_v55, -inf  ;;  %v856_v62 = vld [vmem:[#allocation4] sm:$0xff]  ;;  %v857_v63 = vld [vmem:[#allocation4 + $0x8] sm:$0xff]  ;;  %v1641_v0 = vmov 0.0|0.0   ;;  %v858_v3 = vld [vmem:[#allocation4 + $0x10] sm:$0xff]  ;;  %vm1642_vm14 = vmmov 0   ;;  %v930_v13 = vstv %s1613_s24  ;;  %s1613_s24 = sphi %s1810_s24, %s828_s24   ;;  %v1609_v33 = vphi %v1882_v33, %v1883_v33   ;;  %v1605_v41 = vphi %v822_v41, %v1041_v41   ;;  %v1601_v55 = vphi %v821_v55, %v1040_v55  }
 0x96d   : >> { %834 = vmax.xlane.f32.xlu0 %v833_v56  ;;  %1338 = vmatprep.subr.bf16.mxu0 %v1641_v0  ;;  %v1339_v1 = vpack.c.bf16 %v857_v63, %v856_v62  ;;  %v859_v4 = vld [vmem:[#allocation4 + $0x18] sm:$0xff]  ;;  %v1643_v11 = vmov 0.0   ;;  %v1644_v12 = vmov 32   ;;  %vm932_vm15 = vcmp.lt.f32.partialorder %v1605_v41, 0.5  ;;  %s828_s24 = sadd.s32 1, %s1613_s24  }
 0x96e   : >> { %1344 = vmatprep.subr.bf16.mxu1 %v1641_v0  ;;  %v1342_v6 = vpack.c.bf16 %v859_v4, %v858_v3  ;;  %1276 = vmatprep.mubr.msk.f32.mxu0 %vm1642_vm14, %v1643_v11  ;;  %vm931_vm0 = vcmp.eq.s32.totalorder %v1677_v17, %v930_v13  ;;  %v1645_v14 = vmov 0   ;;  %v1646_v26 = vmov 1.0   ;;  %p825_p10 = scmp.ge.s32.totalorder %s828_s24, 8  }
 0x96f   : >> { %1340 = vmatpush3.bf16.xpose.msra.mxu0 %v1339_v1  ;;  %1346 = vmatpush3.bf16.msra.mxu1 %v1339_v1  ;;  %vm933_vm2 = vmand %vm931_vm0, %vm932_vm15 }
 0x970   : >> { %1341 = vmatprep.subr.bf16.mxu0 %v1641_v0  ;;  %1347 = vmatprep.subr.bf16.mxu1 %v1641_v0  ;;  %v934_v16 = vsel %vm933_vm2, 1, %v1645_v14  ;;  %v1124_v20 = vsel %vm933_vm2, 1.0, %v1643_v11 }
 0x971   : >> { %1287 = vmatprep.mubr.msk.f32.mxu1 %vm1642_vm14, %v1643_v11  ;;  %1481 = vset.pattern.permute.xlu0 %v1644_v12  ;;  %v1041_v41 = vmax.f32 %v1605_v41, %v1124_v20   ;;  %v945_v27 = vsel %vm706_vm8, %v1124_v20, -inf }
 0x972   : >> { %1482 = vset.pattern.permute.xlu1 %v1644_v12  ;;  %v946_v28 = vrot.slane %v945_v27, 4 }
 0x973   : >> { %1349 = vmatpush3.bf16.msra.mxu1 %v1342_v6 }
 0x974   : >> { %v947_v18 = vmax.f32 %v945_v27, %v946_v28 }
 0x976   : >> { %v948_v30 = vrot.slane %v947_v18, 2 }
 0x977   : >> { %1343 = vmatpush3.bf16.xpose.msra.mxu0 %v1342_v6 }
 0x978   : >> { %v949_v38 = vmax.f32 %v947_v18, %v948_v30 }
 0x97a   : >> { %v950_v39 = vrot.slane %v949_v38, 1 }
 0x97c   : >> { %v951_v40 = vmax.f32 %v949_v38, %v950_v39 }
 0x97e   : >> { %vm1033_vm7 = vcmp.gt.f32.partialorder %v951_v40, 0.5 }
 0x97f   : >> { %v1035_v42 = vsel %vm1033_vm7, 1, %v1645_v14 }
 0x9fa   : >> { %v835_v57 = vpop.xlane.xlu0 %834 }
 0x9fb   : >> { %vm836_vm12 = vcmp.ge.f32.partialorder %v1601_v55, %v835_v57 }
 0x9fc   : >> { %v837_v58 = vsel %vm836_vm12, %v1672_v15, 128 }
 0x9fd   : >> { %v838_v59 = vsel %vm282_vm5, %v837_v58, 2147483647 }
 0x9fe   : >> { %v840_v60 = vshra.s32 %v838_v59, 16  ;;  %v839_v7 = vand.u32 65535, %v838_v59 }
 0xa00   : >> { %v842_v61 = vcvt.s32.f32 %v840_v60  ;;  %v841_v9 = vcvt.s32.f32 %v839_v7 }
 0xa02   : >> { %843 = vmin.xlane.f32.xlu0 %v842_v61 }
 0xa18   : >> { %936 = vperm.xlu0 %1481, %v934_v16  }
 0xa8f   : >> { %v844_v8 = vpop.xlane.xlu0 %843 }
 0xa90   : >> { %vm845_vm13 = vcmp.eq.f32.partialorder %v842_v61, %v844_v8  ;;  %v850_v2 = vcvt.f32.s32 %v844_v8 }
 0xa91   : >> { %v846_v10 = vsel %vm845_vm13, %v841_v9, inf }
 0xa92   : >> { %847 = vmin.xlane.f32.xlu1 %v846_v10  ;;  %v851_v23 = vshll.u32 %v850_v2, 16 }
 0xa97   : >> { %v937_v29 = vpop.permute.xlu0 %936 }
 0xa98   : >> { %vm938_vm6 = vcmp.eq.s32.totalorder %v937_v29, 1 }
 0xb1f   : >> { %v848_v22 = vpop.xlane.xlu1 %847 }
 0xb20   : >> { %v849_v24 = vcvt.f32.s32 %v848_v22 }
 0xb22   : >> { %v852_v25 = vadd.s32 %v851_v23, %v849_v24 }
 0xb24   : >> { %vm853_vm3 = vcmp.eq.s32.totalorder %v1672_v15, %v852_v25 }
 0xb25   : >> { %1277 = vmatmul.mubr.msk.f32.vlgmr.msra.gmra.mrb[0].mxu0 %vm853_vm3, %v1646_v26 }
 0xbf8   : >> { %v926_v31 = vpop.f32.mrb[0].mxu0 }
 0xbf9   : >> { %v942_v32 = vrot.slane %v926_v31, %v1683_v21  ;;  %v1278_v34 = vpop.f32.mrb[1].mxu0  ;;  %1288 = vmatmul.mubr.msk.f32.vlgmr.msra.gmra.mrb[0].mxu1 %vm31_vm1, %v926_v31  ;;  %v952_v35 = vmul.f32 %v926_v31, %v926_v31 }
 0xbfb   : >> { %v943_v36 = vsel %vm938_vm6, %v942_v32, %v1609_v33   ;;  %v953_v37 = vsel %vm192_vm4, %v952_v35, 0.0 }
 0xbfc   : >> { %954 = vadd.xlane.f32.xlu1 %v953_v37  ;;  %v1883_v33 = vmov %v943_v36  ;;  %v1884_v18 = vmov (%p825_p10), %v943_v36 }
 0xc0d   : >> { %1037 = vperm.xlu1 %1482, %v1035_v42  }
 0xc89   : >> { %v955_v43 = vpop.xlane.xlu1 %954 }
 0xc8a   : >> { %v1029_v45 = vadd.f32 %v955_v43, %v1680_v19 }
 0xc8d   : >> { %v1038_v49 = vpop.permute.xlu1 %1037 }
 0xc8e   : >> { %vm1039_vm9 = vcmp.eq.s32.totalorder %v1038_v49, 1 }
 0xccc   : >> { %v1025_v44 = vpop.f32.mrb[0].mxu1 }
 0xccd   : >> { %v1030_v46 = vmul.f32 2.0, %v1025_v44  ;;  %v1289_v47 = vpop.f32.mrb[1].mxu1 }
 0xccf   : >> { %v1031_v48 = vsub.f32 %v1029_v45, %v1030_v46  ;;  %827 = sbr.rel (!%p825_p10) target bundleno = 2412 (0x96c), region = 68 }
 0xcd1   : >> { %v1032_v50 = vmax.f32 %v1031_v48, 0.0 }
 0xcd3   : >> { %v1034_v51 = vmin.f32 %v1601_v55, %v1032_v50 }
 0xcd5   : >> { %v1040_v55 = vsel %vm1039_vm9, %v1034_v51, %v1601_v55  }
 0xcd6 PF: > { %p1047_p11 = scmp.le.f32.partialorder %s1784_s22, 0.0001  ;;  %p1048_p12 = scmp.lt.f32.partialorder %s1786_s23, 0.5  ;;  %v1617_v18 = vphi %v1789_v18, %v1884_v18  }
 0xcd7   : > { %s1359_s25 = scalar_select %p726_p9, 0, 1 }
 0xcd8   : > { %s1052_s20 = sadd.s32 1, %s1597_s20   ;;  %p1049_p13 = pnand %p1048_p12, %p1047_p11 }
 0xcd9   : > { %v1356_v52 = vstv %s1359_s25  ;;  %p489_p0 = scmp.lt.s32.totalorder %s1052_s20, 100 }
 0xcda   : > { %vm1357_vm10 = vcmp.ne.s32.totalorder %v1356_v52, 0 }
 0xcdb   : > { %v1358_v53 = vsel %vm1357_vm10, %v1779_v5, %v1617_v18   ;;  %p491_p1 = pnand %p1049_p13, %p489_p0 }
 0xcdc   : > { %v1885_v2 = vmov %v1358_v53  ;;  %1053 = vst.msk [vmem:[#allocation7] sm:$0xff] (%p491_p1), %vm31_vm1, %v1358_v53  ;;  %s1647_s26 = smov (%p491_p1), [#allocation7]  }
 0xcdd   :  { %494 = sbr.rel (!%p491_p1) target bundleno = 1342 (0x53e), region = 79  ;;  %s1060_s27 = sshll.u32 (%p491_p1), %s1647_s26, 4  ;;  %s1061_s27 = int_to_ptr.vmem [resolvable:$true] %s1060_s27 }
 0xcde   :  { %s1505_s28 = scalar_lea.vmem (%p491_p1), %s1061_s27, 128  ;;  %p1510_p3 = scmp.lt.s32.totalorder (%p491_p1), %s1061_s27, %s1061_s27 }
 0xcdf   :  { %p1506_p2 = scmp.ne.s32.totalorder (%p491_p1), %s1061_s27, %s1505_s28  ;;  %p1511_p4 = scmp.lt.s32.totalorder (%p491_p1), %s1505_s28, %s1505_s28 }
 0xce1   :  { %p1512_p5 = por (%p491_p1), %p1511_p4, %p1510_p3 }
 0xce3   :  { %p1513_p6 = pnand (%p491_p1), %p1512_p5, %p1506_p2 }
 0xce5   :  { %1516 = shalt.err (!%p1513_p6)
}
 0xce6   :  { %s1517_s2 = scalar_lea.hbm %s1878_s1, 128 }
 0xce7   :  { %p1518_p7 = scmp.ne.s32.totalorder %s1878_s1, %s1517_s2  ;;  %p1521_p8 = scmp.lt.u32.totalorder %s1517_s2, %s1878_s1 }
 0xce9   :  { %p1523_p9 = pnand %p1521_p8, %p1518_p7 }
 0xceb   :  { %1526 = shalt.err (!%p1523_p9)
}
 0xcec   :  { %1063 = dma.vmem_to_hbm [thread:$0]  %s1061_s27, 128, %s1878_s1, [#allocation6]  }
 0xced   :  { %1573 = dma.done.wait [#allocation6], 128  }
 0xcee   :  { %1574 = vsyncadd [#allocation6], 4294967168 }
 0xcef   :  { %1067 = vsyncpa [#allocation5], 1 }
 0xcf0   :  { %1068 = vsyncpa [#allocation6], 1 }

</bundles_post_ra>
